<compile_context>
chip_gen: v6e
topology: v6e:2x2x1
jax: 0.10.0
libtpu: 0.0.40
codegen_flags: <defaults>
</compile_context>

<pallas_src>
import functools

import jax
import jax.numpy as jnp
from jax.experimental import pallas as pl
from jax.experimental.pallas import tpu as pltpu

INPUT_DIM = 12
HIDDEN_DIMS = (128, 64)
NUM_CLASSES = 7

# Safe on all generations (v7x: 64 MiB VMEM per TensorCore).  v5e/v6e (128 MiB
# VMEM) can use 8192 -- see suggested_tile_b().
DEFAULT_TILE_B = 4096
# Only split a single-tile batch in two (for v7x's second TensorCore) when the
# batch is big enough for the extra grid step to be worth it.
_SPLIT_MIN_BATCH = 512


def _round_up(n, m):
    return ((n + m - 1) // m) * m


def suggested_tile_b():
    """Per-generation batch tile: 8192 on 128-MiB-VMEM chips (v5e/v6e),
    4096 on v7x (64 MiB VMEM per TensorCore)."""
    try:
        if pltpu.get_tpu_info().vmem_capacity_bytes >= (96 << 20):
            return 8192
    except Exception:
        pass
    return DEFAULT_TILE_B


def mlp_softmax_kernel(x_ref, w1_ref, b1_ref, w2_ref, b2_ref, w3_ref, b3_ref,
                       o_ref):
    # Cast the f32 input tile to bf16 in-kernel (MXU dtype); no wrapper pass.
    x = x_ref[...].astype(jnp.bfloat16)
    # Layer 1: Linear + ReLU   (Dropout is identity in eval mode)
    h1 = jnp.dot(x, w1_ref[...], preferred_element_type=jnp.float32)
    h1 = jnp.maximum(h1 + b1_ref[...], 0.0)
    # Layer 2: Linear + ReLU
    h2 = jnp.dot(h1.astype(jnp.bfloat16), w2_ref[...],
                 preferred_element_type=jnp.float32)
    h2 = jnp.maximum(h2 + b2_ref[...], 0.0)
    # Output layer: Linear
    logits = jnp.dot(h2.astype(jnp.bfloat16), w3_ref[...],
                     preferred_element_type=jnp.float32)
    logits = logits + b3_ref[...]
    # Softmax over dim=1.  Last dim is exactly num_classes -> no masking needed.
    m = jnp.max(logits, axis=-1, keepdims=True)
    e = jnp.exp(logits - m)
    s = jnp.sum(e, axis=-1, keepdims=True)
    o_ref[...] = e * pl.reciprocal(s, approx=True)
    # TODO(synk): training-mode Dropout (p=0.1) is not applied; forward here
    # matches PyTorch eval() semantics where Dropout is the identity.


def init_params(key, input_dim=INPUT_DIM, hidden_dims=HIDDEN_DIMS,
                num_classes=NUM_CLASSES):
    """Deterministic init mimicking nn.Linear's U(-1/sqrt(fan_in), 1/sqrt(fan_in))."""
    dims = [input_dim, *hidden_dims, num_classes]
    params = []
    for i in range(len(dims) - 1):
        fan_in, fan_out = dims[i], dims[i + 1]
        key, kw, kb = jax.random.split(key, 3)
        bound = 1.0 / jnp.sqrt(jnp.float32(fan_in))
        w = jax.random.uniform(kw, (fan_in, fan_out), jnp.float32, -bound, bound)
        b = jax.random.uniform(kb, (1, fan_out), jnp.float32, -bound, bound)
        params.append((w, b))
    return params


def prepare_params(params):
    """One-time prep: cast weights to bf16 (native MXU dtype, halves weight HBM
    reads); biases stay f32 for the f32 epilogue."""
    return tuple((w.astype(jnp.bfloat16), b.astype(jnp.float32))
                 for (w, b) in params)


@functools.partial(jax.jit, static_argnames=("tile_b",))
def dnn_classifier_forward(x, params, tile_b=DEFAULT_TILE_B):
    """x: (batch, input_dim) float32 -> (batch, num_classes) softmax probs."""
    (w1, b1), (w2, b2), (w3, b3) = params
    batch, in_dim = x.shape
    h1, h2, nc = w1.shape[1], w2.shape[1], w3.shape[1]

    # Batch tile: multiple of 16, capped at tile_b.  No padding of x -- the
    # grid below uses pl.cdiv and Pallas masks the partial last tile's writes.
    tb = min(tile_b, _round_up(batch, 16))
    # Guarantee >=2 grid steps for mid-size batches so both v7x TensorCores
    # get work under dimension_semantics=("parallel",).
    if pl.cdiv(batch, tb) < 2 and batch >= _SPLIT_MIN_BATCH:
        tb = _round_up(pl.cdiv(batch, 2), 16)
    grid = (pl.cdiv(batch, tb),)

    # Scoped-VMEM budget: ~6 KiB per tile row covers the double-buffered x/out
    # streams plus f32 h1/h2/logit temporaries, with compiler-scratch headroom.
    # Stays well under v7x's 64 MiB physical VMEM at the 4096 default tile.
    vmem_limit = int(max(32 << 20, min(tb * 6144, 100 << 20)))

    cost = pl.CostEstimate(
        flops=2 * batch * (in_dim * h1 + h1 * h2 + h2 * nc),
        transcendentals=batch * (nc + 1),                      # exp + reciprocal
        bytes_accessed=batch * (in_dim + nc) * 4
        + 2 * (in_dim * h1 + h1 * h2 + h2 * nc)                 # bf16 weights
        + 4 * (h1 + h2 + nc),                                   # f32 biases
    )

    resident = lambda i: (0, 0)  # weights/biases stay VMEM-resident across grid
    return pl.pallas_call(
        mlp_softmax_kernel,
        out_shape=jax.ShapeDtypeStruct((batch, nc), jnp.float32),
        grid=grid,
        in_specs=[
            pl.BlockSpec((tb, in_dim), lambda i: (i, 0)),  # x streams by tile
            pl.BlockSpec((in_dim, h1), resident),
            pl.BlockSpec((1, h1), resident),
            pl.BlockSpec((h1, h2), resident),
            pl.BlockSpec((1, h2), resident),
            pl.BlockSpec((h2, nc), resident),
            pl.BlockSpec((1, nc), resident),
        ],
        out_specs=pl.BlockSpec((tb, nc), lambda i: (i, 0)),
        compiler_params=pltpu.CompilerParams(
            dimension_semantics=("parallel",),
            vmem_limit_bytes=vmem_limit),
        cost_estimate=cost,
    )(x, w1, b1, w2, b2, w3, b3)


def reference_forward(x, params):
    """Pure-JAX f32 eval-mode reference (matches the PyTorch module)."""
    (w1, b1), (w2, b2), (w3, b3) = params
    h = jnp.maximum(x @ w1 + b1, 0.0)
    h = jnp.maximum(h @ w2 + b2, 0.0)
    logits = h @ w3 + b3
    return jax.nn.softmax(logits, axis=1)


if __name__ == "__main__":
    key = jax.random.PRNGKey(0)
    key, kx1, kx2 = jax.random.split(key, 3)
    params = init_params(key)
    kernel_params = prepare_params(params)   # bf16 weights, cast once

    # Small batch (one full tile), mirroring the module's default batch_size=16.
    x_small = jax.random.normal(kx1, (16, INPUT_DIM), jnp.float32)
    probs = dnn_classifier_forward(x_small, kernel_params)
    jax.block_until_ready(probs)
    ref = reference_forward(x_small, params)
    assert probs.shape == (16, NUM_CLASSES)
    # bf16 matmul inputs + approx reciprocal -> relaxed (but tight in absolute
    # terms for probabilities) tolerance vs the f32 reference.
    assert jnp.allclose(jnp.sum(probs, axis=1), 1.0, atol=2e-2)
    assert jnp.allclose(probs, ref, atol=2e-2, rtol=2e-2)
    assert jnp.array_equal(jnp.argmax(probs, axis=1), jnp.argmax(ref, axis=1))

    # Larger, non-tile-aligned batch: exercises the >=2-grid-step split (both
    # v7x TensorCores) and the Pallas-masked partial last tile (no pad/slice).
    x_big = jax.random.normal(kx2, (1000, INPUT_DIM), jnp.float32)
    probs_big = dnn_classifier_forward(x_big, kernel_params)
    jax.block_until_ready(probs_big)
    ref_big = reference_forward(x_big, params)
    assert probs_big.shape == (1000, NUM_CLASSES)
    assert jnp.allclose(jnp.sum(probs_big, axis=1), 1.0, atol=2e-2)
    assert jnp.allclose(probs_big, ref_big, atol=2e-2, rtol=2e-2)

    print("KERNEL_OK")
</pallas_src>

<mosaic_0001>
module attributes {stable_mosaic.version = 11 : i64} {
  func.func @mlp_softmax_kernel(%arg0: i32, %arg1: memref<16x12xf32, #tpu.memory_space<vmem>>, %arg2: memref<12x128xbf16, #tpu.memory_space<vmem>>, %arg3: memref<1x128xf32, #tpu.memory_space<vmem>>, %arg4: memref<128x64xbf16, #tpu.memory_space<vmem>>, %arg5: memref<1x64xf32, #tpu.memory_space<vmem>>, %arg6: memref<64x7xbf16, #tpu.memory_space<vmem>>, %arg7: memref<1x7xf32, #tpu.memory_space<vmem>>, %arg8: memref<16x7xf32, #tpu.memory_space<vmem>>) attributes {dimension_semantics = [#tpu.dimension_semantics<parallel>], iteration_bounds = array<i64: 1>, scalar_prefetch = 0 : i64, scratch_operands = 0 : i64, tpu.core_type = #tpu.core_type<tc>, window_params = [{transform_indices = @transform_0, window_bounds = array<i64: 16, 12>}, {pipeline_mode = #tpu.pipeline_mode<synchronous>, transform_indices = @transform_1, window_bounds = array<i64: 12, 128>}, {pipeline_mode = #tpu.pipeline_mode<synchronous>, transform_indices = @transform_2, window_bounds = array<i64: 1, 128>}, {pipeline_mode = #tpu.pipeline_mode<synchronous>, transform_indices = @transform_3, window_bounds = array<i64: 128, 64>}, {pipeline_mode = #tpu.pipeline_mode<synchronous>, transform_indices = @transform_4, window_bounds = array<i64: 1, 64>}, {pipeline_mode = #tpu.pipeline_mode<synchronous>, transform_indices = @transform_5, window_bounds = array<i64: 64, 7>}, {pipeline_mode = #tpu.pipeline_mode<synchronous>, transform_indices = @transform_6, window_bounds = array<i64: 1, 7>}, {transform_indices = @transform_7, window_bounds = array<i64: 16, 7>}]} {
    %c0 = arith.constant 0 : index
    %c0_0 = arith.constant 0 : index
    %0 = vector.load %arg1[%c0, %c0_0] : memref<16x12xf32, #tpu.memory_space<vmem>>, vector<16x12xf32>
    %1 = arith.truncf %0 : vector<16x12xf32> to vector<16x12xbf16>
    %c0_1 = arith.constant 0 : index
    %c0_2 = arith.constant 0 : index
    %2 = vector.load %arg2[%c0_1, %c0_2] : memref<12x128xbf16, #tpu.memory_space<vmem>>, vector<12x128xbf16>
    %cst = arith.constant dense<0.000000e+00> : vector<16x128xf32>
    %3 = tpu.matmul %1, %2, %cst {dimension_numbers = #tpu.dot_dimension_numbers<[1], [0], [0], [1], [0, 0, 1, 1], [], []>} : vector<16x12xbf16>, vector<12x128xbf16>, vector<16x128xf32> -> vector<16x128xf32>
    %c0_3 = arith.constant 0 : index
    %c0_4 = arith.constant 0 : index
    %4 = vector.load %arg3[%c0_3, %c0_4] : memref<1x128xf32, #tpu.memory_space<vmem>>, vector<1x128xf32>
    %5 = vector.broadcast %4 : vector<1x128xf32> to vector<16x128xf32>
    %6 = arith.addf %3, %5 : vector<16x128xf32>
    %cst_5 = arith.constant 0.000000e+00 : f32
    %7 = vector.broadcast %cst_5 : f32 to vector<16x128xf32>
    %8 = arith.maximumf %6, %7 : vector<16x128xf32>
    %9 = arith.truncf %8 : vector<16x128xf32> to vector<16x128xbf16>
    %c0_6 = arith.constant 0 : index
    %c0_7 = arith.constant 0 : index
    %10 = vector.load %arg4[%c0_6, %c0_7] : memref<128x64xbf16, #tpu.memory_space<vmem>>, vector<128x64xbf16>
    %cst_8 = arith.constant dense<0.000000e+00> : vector<16x64xf32>
    %11 = tpu.matmul %9, %10, %cst_8 {dimension_numbers = #tpu.dot_dimension_numbers<[1], [0], [0], [1], [0, 0, 1, 1], [], []>} : vector<16x128xbf16>, vector<128x64xbf16>, vector<16x64xf32> -> vector<16x64xf32>
    %c0_9 = arith.constant 0 : index
    %c0_10 = arith.constant 0 : index
    %12 = vector.load %arg5[%c0_9, %c0_10] : memref<1x64xf32, #tpu.memory_space<vmem>>, vector<1x64xf32>
    %13 = vector.broadcast %12 : vector<1x64xf32> to vector<16x64xf32>
    %14 = arith.addf %11, %13 : vector<16x64xf32>
    %cst_11 = arith.constant 0.000000e+00 : f32
    %15 = vector.broadcast %cst_11 : f32 to vector<16x64xf32>
    %16 = arith.maximumf %14, %15 : vector<16x64xf32>
    %17 = arith.truncf %16 : vector<16x64xf32> to vector<16x64xbf16>
    %c0_12 = arith.constant 0 : index
    %c0_13 = arith.constant 0 : index
    %18 = vector.load %arg6[%c0_12, %c0_13] : memref<64x7xbf16, #tpu.memory_space<vmem>>, vector<64x7xbf16>
    %cst_14 = arith.constant dense<0.000000e+00> : vector<16x7xf32>
    %19 = tpu.matmul %17, %18, %cst_14 {dimension_numbers = #tpu.dot_dimension_numbers<[1], [0], [0], [1], [0, 0, 1, 1], [], []>} : vector<16x64xbf16>, vector<64x7xbf16>, vector<16x7xf32> -> vector<16x7xf32>
    %c0_15 = arith.constant 0 : index
    %c0_16 = arith.constant 0 : index
    %20 = vector.load %arg7[%c0_15, %c0_16] : memref<1x7xf32, #tpu.memory_space<vmem>>, vector<1x7xf32>
    %21 = vector.broadcast %20 : vector<1x7xf32> to vector<16x7xf32>
    %22 = arith.addf %19, %21 : vector<16x7xf32>
    %cst_17 = arith.constant dense<0xFF800000> : vector<16xf32>
    %23 = vector.multi_reduction <maximumf>, %22, %cst_17 [1] : vector<16x7xf32> to vector<16xf32>
    %24 = vector.shape_cast %23 : vector<16xf32> to vector<16x1xf32>
    %25 = vector.broadcast %24 : vector<16x1xf32> to vector<16x7xf32>
    %26 = arith.subf %22, %25 : vector<16x7xf32>
    %27 = math.exp %26 : vector<16x7xf32>
    %cst_18 = arith.constant dense<0.000000e+00> : vector<16xf32>
    %28 = vector.multi_reduction <add>, %27, %cst_18 [1] : vector<16x7xf32> to vector<16xf32>
    %29 = vector.shape_cast %28 : vector<16xf32> to vector<16x1xf32>
    %30 = tpu.reciprocal %29 {approx = true} : vector<16x1xf32> -> vector<16x1xf32>
    %31 = vector.broadcast %30 : vector<16x1xf32> to vector<16x7xf32>
    %32 = arith.mulf %27, %31 : vector<16x7xf32>
    %c0_19 = arith.constant 0 : index
    %c0_20 = arith.constant 0 : index
    %33 = vector.load %arg8[%c0_19, %c0_20] : memref<16x7xf32, #tpu.memory_space<vmem>>, vector<16x7xf32>
    tpu.vector_store %arg8[%c0_19, %c0_20], %32 {strides = array<i32>} : memref<16x7xf32, #tpu.memory_space<vmem>>, vector<16x7xf32>,
    return
  }
  func.func @transform_0(%arg0: i32) -> (i32, i32) {
    %c0_i32 = arith.constant 0 : i32
    %c0_i32_0 = arith.constant 0 : i32
    return %arg0, %c0_i32 : i32, i32
  }
  func.func @transform_1(%arg0: i32) -> (i32, i32) {
    %c0_i32 = arith.constant 0 : i32
    %c0_i32_0 = arith.constant 0 : i32
    %c0_i32_1 = arith.constant 0 : i32
    return %c0_i32, %c0_i32_0 : i32, i32
  }
  func.func @transform_2(%arg0: i32) -> (i32, i32) {
    %c0_i32 = arith.constant 0 : i32
    %c0_i32_0 = arith.constant 0 : i32
    %c0_i32_1 = arith.constant 0 : i32
    return %c0_i32, %c0_i32_0 : i32, i32
  }
  func.func @transform_3(%arg0: i32) -> (i32, i32) {
    %c0_i32 = arith.constant 0 : i32
    %c0_i32_0 = arith.constant 0 : i32
    %c0_i32_1 = arith.constant 0 : i32
    return %c0_i32, %c0_i32_0 : i32, i32
  }
  func.func @transform_4(%arg0: i32) -> (i32, i32) {
    %c0_i32 = arith.constant 0 : i32
    %c0_i32_0 = arith.constant 0 : i32
    %c0_i32_1 = arith.constant 0 : i32
    return %c0_i32, %c0_i32_0 : i32, i32
  }
  func.func @transform_5(%arg0: i32) -> (i32, i32) {
    %c0_i32 = arith.constant 0 : i32
    %c0_i32_0 = arith.constant 0 : i32
    %c0_i32_1 = arith.constant 0 : i32
    return %c0_i32, %c0_i32_0 : i32, i32
  }
  func.func @transform_6(%arg0: i32) -> (i32, i32) {
    %c0_i32 = arith.constant 0 : i32
    %c0_i32_0 = arith.constant 0 : i32
    %c0_i32_1 = arith.constant 0 : i32
    return %c0_i32, %c0_i32_0 : i32, i32
  }
  func.func @transform_7(%arg0: i32) -> (i32, i32) {
    %c0_i32 = arith.constant 0 : i32
    %c0_i32_0 = arith.constant 0 : i32
    return %arg0, %c0_i32 : i32, i32
  }
}

</mosaic_0001>

<bundles_post_ra>
// kernel: dnn_classifier_forward.1
= control target key start
LH: loop header
LB: loop body
LE: loop exit
PB: predicated region body
PF: predicated region fallthrough
CT: control target
= control target key end

     0   :  { %vm48_vm0 = vcmask 1045504   ;;  %v419_v0 = vmov 0.0   ;;  %vm420_vm1 = vmmov 0   ;;  %vm44_vm2 = vcmask 97280   ;;  %s530_s1 = inlined_call_operand.vmem [shape: bf16[12,128], index: 1, kind: input, shape index: {}]   ;;  %s531_s0 = inlined_call_operand.vmem [shape: f32[16,12], index: 0, kind: input, shape index: {}]   ;;  %s532_s3 = inlined_call_operand.vmem [shape: bf16[128,64], index: 3, kind: input, shape index: {}]   ;;  %s533_s5 = inlined_call_operand.vmem [shape: bf16[64,7], index: 5, kind: input, shape index: {}]   ;;  %s534_s2 = inlined_call_operand.vmem [shape: f32[1,128], index: 2, kind: input, shape index: {}]   ;;  %s535_s4 = inlined_call_operand.vmem [shape: f32[1,64], index: 4, kind: input, shape index: {}]   ;;  %s536_s6 = inlined_call_operand.vmem [shape: f32[1,7], index: 6, kind: input, shape index: {}]   ;;  %s537_s7 = inlined_call_operand.vmem [shape: f32[16,7], index: 7, kind: output, shape index: {}]  }
   0x1   :  { %358 = vmatprep.subr.bf16.mxu0 %v419_v0  ;;  %v398_v1 = vld [vmem:[%s530_s1] sm:$0x3f]   ;;  %360 = vmatprep.mubr.msk.bf16.mxu0 %vm420_vm1, %v419_v0  ;;  %v28_v3 = vld [vmem:[%s531_s0 + $0x8] sm:$0xff]  ;;  %v399_v6 = vld [vmem:[%s532_s3 + $0x38] sm:$0xff]   ;;  %vm250_vm3 = vcmask 523264   ;;  %vm295_vm4 = vcmask 56320  }
   0x2   :  { %v27_v2 = vld [vmem:[%s531_s0] sm:$0xff]  ;;  %364 = vmatprep.subr.bf16.mxu1 %v419_v0  ;;  %380 = vmatprep.mubr.msk.bf16.mxu1 %vm420_vm1, %v419_v0  ;;  %v50_v4 = vsel %vm48_vm0, %v398_v1, 0  ;;  %v400_v7 = vld [vmem:[%s532_s3 + $0x30] sm:$0xff]   ;;  %v401_v8 = vld [vmem:[%s532_s3 + $0x28] sm:$0xff]  }
   0x3   :  { %v29_v5 = vpack.c.bf16 %v28_v3, %v27_v2  ;;  %359 = vmatpush3.bf16.msra.mxu0 %v50_v4  ;;  %365 = vmatpush3.bf16.msra.mxu1 %v399_v6  ;;  %v402_v9 = vld [vmem:[%s532_s3 + $0x20] sm:$0xff]   ;;  %v403_v10 = vld [vmem:[%s532_s3 + $0x18] sm:$0xff]   ;;  %v404_v11 = vld [vmem:[%s532_s3 + $0x10] sm:$0xff]  }
   0x4   :  { %384 = vmatprep.subr.bf16.mxu0 %v419_v0  ;;  %366 = vmatprep.subr.bf16.mxu1 %v419_v0  ;;  %v405_v12 = vld [vmem:[%s532_s3 + $0x8] sm:$0xff]   ;;  %v406_v13 = vld [vmem:[%s532_s3] sm:$0xff]   ;;  %v407_v14 = vld [vmem:[%s533_s5 + $0x18] sm:$0xff]  }
   0x5   :  { %v324_v15 = vld [vmem:[%s534_s2] ss:$0 sm:$0xff]  ;;  %v408_v25 = vld [vmem:[%s533_s5 + $0x10] sm:$0xff]   ;;  %v409_v26 = vld [vmem:[%s533_s5 + $0x8] sm:$0xff]  }
   0x6   :  { %361 = vmatmul.mubr.msk.bf16.vlgmr.msra.gmra.mxu0 %vm44_vm2, %v29_v5  ;;  %v410_v27 = vld [vmem:[%s533_s5] sm:$0xff]  }
   0x7   :  { %392 = vmatprep.mubr.msk.bf16.mxu0 %vm420_vm1, %v419_v0  ;;  %367 = vmatpush3.bf16.msra.mxu1 %v400_v7  ;;  %v327_v28 = vld [vmem:[%s535_s4] ss:$0 sm:$0xff] }
   0x8   :  { %368 = vmatprep.subr.bf16.mxu1 %v419_v0  ;;  %385 = vmatpush3.bf16.msra.mxu0 %v407_v14  ;;  %v336_v38 = vld [vmem:[%s536_s6] ss:$0 sm:$0xff] }
   0x9   :  { %386 = vmatprep.subr.bf16.mxu0 %v419_v0 }
   0xb   :  { %369 = vmatpush3.bf16.msra.mxu1 %v401_v8 }
   0xc   :  { %370 = vmatprep.subr.bf16.mxu1 %v419_v0  ;;  %387 = vmatpush3.bf16.msra.mxu0 %v408_v25 }
   0xd   :  { %388 = vmatprep.subr.bf16.mxu0 %v419_v0 }
   0xf   :  { %371 = vmatpush3.bf16.msra.mxu1 %v402_v9 }
  0x10   :  { %372 = vmatprep.subr.bf16.mxu1 %v419_v0  ;;  %389 = vmatpush3.bf16.msra.mxu0 %v409_v26 }
  0x11   :  { %390 = vmatprep.subr.bf16.mxu0 %v419_v0 }
  0x13   :  { %373 = vmatpush3.bf16.msra.mxu1 %v403_v10 }
  0x14   :  { %374 = vmatprep.subr.bf16.mxu1 %v419_v0  ;;  %391 = vmatpush3.bf16.msra.mxu0 %v410_v27 }
  0x17   :  { %375 = vmatpush3.bf16.msra.mxu1 %v404_v11 }
  0x18   :  { %376 = vmatprep.subr.bf16.mxu1 %v419_v0 }
  0x1b   :  { %377 = vmatpush3.bf16.msra.mxu1 %v405_v12 }
  0x1c   :  { %378 = vmatprep.subr.bf16.mxu1 %v419_v0 }
  0x1f   :  { %379 = vmatpush3.bf16.msra.mxu1 %v406_v13 }
  0xc6   :  { %v86_v16 = vpop.f32.mrf.mxu0 }
  0xc7   :  { %v87_v18 = vadd.f32 %v324_v15, %v86_v16 }
  0xc8   :  { %v362_v17 = vpop.f32.mrf.mxu0 }
  0xc9   :  { %v93_v22 = vmax.f32 %v87_v18, 0.0 }
  0xca   :  { %v89_v19 = vpop.f32.mrf.mxu0 }
  0xcb   :  { %v90_v20 = vadd.f32 %v324_v15, %v89_v19 }
  0xcc   :  { %v363_v21 = vpop.f32.mrf.mxu0 }
  0xcd   :  { %v94_v23 = vmax.f32 %v90_v20, 0.0 }
  0xcf   :  { %v95_v24 = vpack.c.bf16 %v94_v23, %v93_v22 }
  0xd1   :  { %381 = vmatmul.mubr.bf16.vlgmr.msra.gmra.mxu1 %v95_v24 }
 0x191   :  { %v201_v29 = vpop.f32.mrf.mxu1 }
 0x192   :  { %v202_v31 = vadd.f32 %v327_v28, %v201_v29 }
 0x193   :  { %v382_v30 = vpop.f32.mrf.mxu1 }
 0x194   :  { %v208_v35 = vmax.f32 %v202_v31, 0.0 }
 0x195   :  { %v204_v32 = vpop.f32.mrf.mxu1 }
 0x196   :  { %v205_v33 = vadd.f32 %v327_v28, %v204_v32 }
 0x197   :  { %v383_v34 = vpop.f32.mrf.mxu1 }
 0x198   :  { %v209_v36 = vmax.f32 %v205_v33, 0.0 }
 0x19a   :  { %v210_v37 = vpack.c.bf16 %v209_v36, %v208_v35 }
 0x19c   :  { %393 = vmatmul.mubr.msk.bf16.vlgmr.msra.gmra.mxu0 %vm250_vm3, %v210_v37 }
 0x25c   :  { %v288_v39 = vpop.f32.mrf.mxu0 }
 0x25d   :  { %v289_v40 = vadd.f32 %v336_v38, %v288_v39 }
 0x25e   :  { %v394_v41 = vpop.f32.mrf.mxu0 }
 0x25f   :  { %v296_v42 = vsel %vm295_vm4, %v289_v40, -inf }
 0x260   :  { %297 = vmax.xlane.f32.xlu0 %v296_v42  ;;  %v291_v43 = vpop.f32.mrf.mxu0 }
 0x261   :  { %v292_v44 = vadd.f32 %v336_v38, %v291_v43 }
 0x262   :  { %v395_v45 = vpop.f32.mrf.mxu0 }
 0x263   :  { %v299_v46 = vsel %vm295_vm4, %v292_v44, -inf }
 0x264   :  { %300 = vmax.xlane.f32.xlu0 %v299_v46 }
 0x2e9   :  { %v298_v47 = vpop.xlane.xlu0 %297 }
 0x2ea   :  { %v302_v48 = vsub.f32 %v289_v40, %v298_v47 }
 0x2ec   :  { %v304_v49 = vmul.f32 1.442695, %v302_v48 }
 0x2ed   :  { %v301_v50 = vpop.xlane.xlu0 %300 }
 0x2ee   :  { %411 = vpow2.f32 %v304_v49  ;;  %v303_v51 = vsub.f32 %v292_v44, %v301_v50 }
 0x2f0   :  { %v306_v52 = vmul.f32 1.442695, %v303_v51 }
 0x2f2   :  { %413 = vpow2.f32 %v306_v52 }
 0x2fb   :  { %v412_v53 = vpop.eup %411 }
 0x2fc   :  { %v308_v54 = vsel %vm295_vm4, %v412_v53, 0.0 }
 0x2fd   :  { %309 = vadd.xlane.f32.xlu1 %v308_v54 }
 0x2ff   :  { %v414_v55 = vpop.eup %413 }
 0x300   :  { %v311_v56 = vsel %vm295_vm4, %v414_v55, 0.0 }
 0x301   :  { %312 = vadd.xlane.f32.xlu1 %v311_v56 }
 0x386   :  { %v310_v57 = vpop.xlane.xlu1 %309 }
 0x387   :  { %415 = vrcp.f32 %v310_v57 }
 0x38a   :  { %v313_v58 = vpop.xlane.xlu1 %312 }
 0x38b   :  { %417 = vrcp.f32 %v313_v58 }
 0x394   :  { %v416_v59 = vpop.eup %415 }
 0x395   :  { %v316_v60 = vmul.f32 %v416_v59, %v412_v53 }
 0x397   :  { %318 = vst.msk [vmem:[%s537_s7] sm:$0xff] %vm295_vm4, %v316_v60 }
 0x398   :  { %v418_v61 = vpop.eup %417 }
 0x399   :  { %v317_v62 = vmul.f32 %v418_v61, %v414_v55 }
 0x39b   :  { %319 = vst.msk [vmem:[%s537_s7 + $0x8] sm:$0xff] %vm295_vm4, %v317_v62 }

</bundles_post_ra>
